<compile_context>
chip_gen: v5e
topology: v5e:2x2
jax: 0.10.0
libtpu: 0.0.40
codegen_flags: <defaults>
</compile_context>

<pallas_src>
import jax
import jax.numpy as jnp
from jax.experimental import pallas as pl
from jax.experimental.pallas import tpu as pltpu


def mlp_kernel(xT_ref, w1_ref, b1_ref, w2_ref, b2_ref, o_ref):
    # xT_ref: (IN, TB)   batch in lanes
    # w1_ref: (HP, IN)   PyTorch layout, hidden zero-padded to HP
    # b1_ref: (HP, 1)
    # w2_ref: (HP, 1)
    # b2_ref: (1, 1)     SMEM scalar
    # o_ref : (1, TB)    lane-dense output block
    h = jnp.dot(w1_ref[...], xT_ref[...],
                preferred_element_type=jnp.float32)          # (HP, TB) on MXU
    h = jnp.maximum(h + b1_ref[...], 0.0)                    # bias + ReLU (VPU)
    # linear2 (out_features=1) as mul + sublane reduction -> (1, TB)
    z = jnp.sum(h * w2_ref[...], axis=0, keepdims=True) + b2_ref[0, 0]
    o_ref[...] = jax.nn.sigmoid(z).astype(o_ref.dtype)       # EUP


def neural_net_forward(x, w1, b1, w2, b2, *, batch_tile=256):
    """Forward pass of the PyTorch NeuralNet.

    x : (B, input_size)
    w1: (hidden_size, input_size)   -- PyTorch nn.Linear convention
    b1: (hidden_size,)
    w2: (1, hidden_size)
    b2: (1,)
    returns: (B, 1) float32
    """
    B, in_features = x.shape
    hidden = w1.shape[0]
    f32 = jnp.float32

    TB = batch_tile
    Bp = pl.cdiv(B, TB) * TB                         # pad batch to tile multiple
    HP = max(128, ((hidden + 127) // 128) * 128)     # lane-align hidden (exact zero-pad)

    # Layout glue (ideally done once at parameter-load time, not per call).
    xT = jnp.zeros((in_features, Bp), f32).at[:, :B].set(x.T.astype(f32))
    w1_p = jnp.zeros((HP, in_features), f32).at[:hidden, :].set(w1.astype(f32))
    b1_p = jnp.zeros((HP, 1), f32).at[:hidden, 0].set(b1.astype(f32))
    w2_p = jnp.zeros((HP, 1), f32).at[:hidden, 0].set(w2.reshape(-1).astype(f32))
    b2_s = b2.reshape(1, 1).astype(f32)

    cost = pl.CostEstimate(
        flops=2 * HP * in_features * Bp + 4 * HP * Bp,
        transcendentals=Bp,
        bytes_accessed=4 * (xT.size + w1_p.size + b1_p.size + w2_p.size + Bp),
    )

    out = pl.pallas_call(
        mlp_kernel,
        out_shape=jax.ShapeDtypeStruct((1, Bp), f32),
        grid=(Bp // TB,),
        in_specs=[
            pl.BlockSpec((in_features, TB), lambda i: (0, i)),            # x^T tile
            pl.BlockSpec((HP, in_features), lambda i: (0, 0)),            # w1 resident
            pl.BlockSpec((HP, 1), lambda i: (0, 0)),                      # b1 resident
            pl.BlockSpec((HP, 1), lambda i: (0, 0)),                      # w2 resident
            pl.BlockSpec((1, 1), lambda i: (0, 0),
                         memory_space=pltpu.SMEM),                        # b2 scalar
        ],
        out_specs=pl.BlockSpec((1, TB), lambda i: (0, i)),                # lane-dense out
        compiler_params=pltpu.CompilerParams(
            dimension_semantics=("parallel",),
        ),
        cost_estimate=cost,
    )(xT, w1_p, b1_p, w2_p, b2_s)

    return out[0, :B].reshape(B, 1)


if __name__ == "__main__":
    key = jax.random.PRNGKey(0)
    batch, input_size, hidden_size = 8, 16, 32

    k_x, k_w1, k_b1, k_w2, k_b2 = jax.random.split(key, 5)
    x = jax.random.normal(k_x, (batch, input_size), dtype=jnp.float32)
    # Deterministic parameter init (synthetic; PyTorch-shaped).
    w1 = jax.random.normal(k_w1, (hidden_size, input_size), dtype=jnp.float32) * 0.1
    b1 = jax.random.normal(k_b1, (hidden_size,), dtype=jnp.float32) * 0.1
    w2 = jax.random.normal(k_w2, (1, hidden_size), dtype=jnp.float32) * 0.1
    b2 = jax.random.normal(k_b2, (1,), dtype=jnp.float32) * 0.1

    out = neural_net_forward(x, w1, b1, w2, b2)
    jax.block_until_ready(out)

    # Reference check in plain JAX.
    ref = jax.nn.sigmoid(jnp.maximum(x @ w1.T + b1, 0.0) @ w2.T + b2)
    assert out.shape == (batch, 1)
    assert jnp.allclose(out, ref, atol=1e-5), "mismatch vs reference"
    print("KERNEL_OK")
</pallas_src>

<mosaic_0001>
module attributes {stable_mosaic.version = 11 : i64} {
  func.func @mlp_kernel(%arg0: i32, %arg1: memref<16x256xf32, #tpu.memory_space<vmem>>, %arg2: memref<128x16xf32, #tpu.memory_space<vmem>>, %arg3: memref<128x1xf32, #tpu.memory_space<vmem>>, %arg4: memref<128x1xf32, #tpu.memory_space<vmem>>, %arg5: memref<1x1xf32, #tpu.memory_space<smem>>, %arg6: memref<1x256xf32, #tpu.memory_space<vmem>>) attributes {dimension_semantics = [#tpu.dimension_semantics<parallel>], iteration_bounds = array<i64: 1>, scalar_prefetch = 0 : i64, scratch_operands = 0 : i64, tpu.core_type = #tpu.core_type<tc>, window_params = [{transform_indices = @transform_0, window_bounds = array<i64: 16, 256>}, {pipeline_mode = #tpu.pipeline_mode<synchronous>, transform_indices = @transform_1, window_bounds = array<i64: 128, 16>}, {pipeline_mode = #tpu.pipeline_mode<synchronous>, transform_indices = @transform_2, window_bounds = array<i64: 128, 1>}, {pipeline_mode = #tpu.pipeline_mode<synchronous>, transform_indices = @transform_3, window_bounds = array<i64: 128, 1>}, {transform_indices = @transform_4, window_bounds = array<i64: 1, 1>}, {transform_indices = @transform_5, window_bounds = array<i64: 1, 256>}]} {
    %c0 = arith.constant 0 : index
    %c0_0 = arith.constant 0 : index
    %0 = vector.load %arg2[%c0, %c0_0] : memref<128x16xf32, #tpu.memory_space<vmem>>, vector<128x16xf32>
    %c0_1 = arith.constant 0 : index
    %c0_2 = arith.constant 0 : index
    %1 = vector.load %arg1[%c0_1, %c0_2] : memref<16x256xf32, #tpu.memory_space<vmem>>, vector<16x256xf32>
    %cst = arith.constant dense<0.000000e+00> : vector<128x256xf32>
    %2 = tpu.matmul %0, %1, %cst {dimension_numbers = #tpu.dot_dimension_numbers<[1], [0], [0], [1], [0, 0, 1, 1], [], []>} : vector<128x16xf32>, vector<16x256xf32>, vector<128x256xf32> -> vector<128x256xf32>
    %c0_3 = arith.constant 0 : index
    %c0_4 = arith.constant 0 : index
    %3 = vector.load %arg3[%c0_3, %c0_4] : memref<128x1xf32, #tpu.memory_space<vmem>>, vector<128x1xf32>
    %4 = vector.broadcast %3 : vector<128x1xf32> to vector<128x256xf32>
    %5 = arith.addf %2, %4 : vector<128x256xf32>
    %cst_5 = arith.constant 0.000000e+00 : f32
    %6 = vector.broadcast %cst_5 : f32 to vector<128x256xf32>
    %7 = arith.maximumf %5, %6 : vector<128x256xf32>
    %c0_6 = arith.constant 0 : index
    %c0_7 = arith.constant 0 : index
    %8 = vector.load %arg4[%c0_6, %c0_7] : memref<128x1xf32, #tpu.memory_space<vmem>>, vector<128x1xf32>
    %9 = vector.broadcast %8 : vector<128x1xf32> to vector<128x256xf32>
    %10 = arith.mulf %7, %9 : vector<128x256xf32>
    %cst_8 = arith.constant dense<0.000000e+00> : vector<256xf32>
    %11 = vector.multi_reduction <add>, %10, %cst_8 [0] : vector<128x256xf32> to vector<256xf32>
    %12 = vector.shape_cast %11 : vector<256xf32> to vector<1x256xf32>
    %c0_9 = arith.constant 0 : index
    %c0_10 = arith.constant 0 : index
    %13 = memref.load %arg5[%c0_9, %c0_10] : memref<1x1xf32, #tpu.memory_space<smem>>
    %14 = vector.broadcast %13 : f32 to vector<1x256xf32>
    %15 = arith.addf %12, %14 : vector<1x256xf32>
    %16 = arith.negf %15 : vector<1x256xf32>
    %17 = math.exp %16 : vector<1x256xf32>
    %cst_11 = arith.constant 1.000000e+00 : f32
    %18 = vector.broadcast %cst_11 : f32 to vector<1x256xf32>
    %19 = arith.addf %18, %17 : vector<1x256xf32>
    %20 = arith.divf %18, %19 : vector<1x256xf32>
    %c0_12 = arith.constant 0 : index
    %c0_13 = arith.constant 0 : index
    %21 = vector.load %arg6[%c0_12, %c0_13] : memref<1x256xf32, #tpu.memory_space<vmem>>, vector<1x256xf32>
    tpu.vector_store %arg6[%c0_12, %c0_13], %20 {strides = array<i32>} : memref<1x256xf32, #tpu.memory_space<vmem>>, vector<1x256xf32>,
    return
  }
  func.func @transform_0(%arg0: i32) -> (i32, i32) {
    %c0_i32 = arith.constant 0 : i32
    %c0_i32_0 = arith.constant 0 : i32
    return %c0_i32, %arg0 : i32, i32
  }
  func.func @transform_1(%arg0: i32) -> (i32, i32) {
    %c0_i32 = arith.constant 0 : i32
    %c0_i32_0 = arith.constant 0 : i32
    %c0_i32_1 = arith.constant 0 : i32
    return %c0_i32, %c0_i32_0 : i32, i32
  }
  func.func @transform_2(%arg0: i32) -> (i32, i32) {
    %c0_i32 = arith.constant 0 : i32
    %c0_i32_0 = arith.constant 0 : i32
    %c0_i32_1 = arith.constant 0 : i32
    return %c0_i32, %c0_i32_0 : i32, i32
  }
  func.func @transform_3(%arg0: i32) -> (i32, i32) {
    %c0_i32 = arith.constant 0 : i32
    %c0_i32_0 = arith.constant 0 : i32
    %c0_i32_1 = arith.constant 0 : i32
    return %c0_i32, %c0_i32_0 : i32, i32
  }
  func.func @transform_4(%arg0: i32) -> (i32, i32) {
    %c0_i32 = arith.constant 0 : i32
    %c0_i32_0 = arith.constant 0 : i32
    %c0_i32_1 = arith.constant 0 : i32
    return %c0_i32, %c0_i32_0 : i32, i32
  }
  func.func @transform_5(%arg0: i32) -> (i32, i32) {
    %c0_i32 = arith.constant 0 : i32
    %c0_i32_0 = arith.constant 0 : i32
    return %c0_i32, %arg0 : i32, i32
  }
}

</mosaic_0001>

<bundles_post_ra>
// kernel: tpu_custom_call.1
= control target key start
LH: loop header
LB: loop body
LE: loop exit
PB: predicated region body
PF: predicated region fallthrough
CT: control target
= control target key end

     0   :  { %v665_v2 = vmov 0   ;;  %vm138_vm0 = vcmask 130048   ;;  %s985_s0 = inlined_call_operand.vmem [shape: f32[16,256], index: 0, kind: input, shape index: {}]   ;;  %s986_s1 = inlined_call_operand.vmem [shape: f32[128,16], index: 1, kind: input, shape index: {}]   ;;  %s987_s2 = inlined_call_operand.vmem [shape: f32[128,1], index: 2, kind: input, shape index: {}]   ;;  %s988_s3 = inlined_call_operand.vmem [shape: f32[128,1], index: 3, kind: input, shape index: {}]   ;;  %s989_s4 = inlined_call_operand.<no memory space> [shape: f32[1,1], index: 4, kind: input, shape index: {}]   ;;  %s990_s5 = inlined_call_operand.hbm [shape: f32[1,256], index: 5, kind: output, shape index: {}]  }
   0x1   :  { %v40_v0 = vld [vmem:[%s985_s0 + $0x10] sm:$0xff]  ;;  %v41_v1 = vld [vmem:[%s985_s0 + $0x18] sm:$0xff]  ;;  %630 = vset.pattern.permute.xlu2 %v665_v2  ;;  %629 = vset.pattern.permute.xlu1 %v665_v2  ;;  %v46_v3 = vld [vmem:[%s987_s2 + $0x20] sm:$0xff] }
   0x2   :  { %628 = vset.pattern.permute.xlu0 %v665_v2  ;;  %201 = vmatpush.msra.mxu0 %v40_v0  ;;  %v44_v4 = vld [vmem:[%s987_s2 + $0x10] sm:$0xff]  ;;  %v42_v5 = vld [vmem:[%s987_s2] sm:$0xff]  ;;  %v39_v7 = vld [vmem:[%s985_s0 + $0x8] sm:$0xff] }
   0x3   :  { %622 = vmatpush.msra.mxu2 %v40_v0  ;;  %266 = vmatpush.msra.mxu1 %v41_v1  ;;  %v38_v6 = vld [vmem:[%s985_s0] sm:$0xff]  ;;  %v47_v10 = vld [vmem:[%s987_s2 + $0x28] sm:$0xff]  ;;  %v45_v11 = vld [vmem:[%s987_s2 + $0x18] sm:$0xff] }
   0x4   :  { %624 = vmatpush.msra.mxu3 %v41_v1  ;;  %80 = vperm.xlu2 %630, %v46_v3   ;;  %v22_v8 = vld [vmem:[%s986_s1] sm:$0xff]  ;;  %v43_v12 = vld [vmem:[%s987_s2 + $0x8] sm:$0xff] }
   0x5   :  { %70 = vperm.xlu1 %629, %v44_v4   ;;  %60 = vperm.xlu0 %628, %v42_v5   ;;  %v30_v9 = vld [vmem:[%s986_s1 + $0x40] sm:$0xff] }
   0x6   :  { %202 = vmatpush.msra.mxu0 %v38_v6  ;;  %623 = vmatpush.msra.mxu2 %v38_v6 }
   0x7   :  { %267 = vmatpush.msra.mxu1 %v39_v7  ;;  %625 = vmatpush.msra.mxu3 %v39_v7 }
   0x8   :  { %588 = vmatmul.msk.f32.vlgmr.msra.gmra.mxu0 %vm138_vm0, %v22_v8  ;;  %596 = vmatmul.msk.f32.vlgmr.msra.gmra.mxu2 %vm138_vm0, %v30_v9 }
   0x9   :  { %604 = vmatmul.msk.f32.vlgmr.msra.gmra.mxu1 %vm138_vm0, %v22_v8  ;;  %612 = vmatmul.msk.f32.vlgmr.msra.gmra.mxu3 %vm138_vm0, %v30_v9 }
   0xa   :  { %11 = vsyncpa [#allocation4], 0  ;;  %v23_v13 = vld [vmem:[%s986_s1 + $0x8] sm:$0xff]  ;;  %v50_v15 = vld [vmem:[%s987_s2 + $0x40] sm:$0xff]  ;;  %s579_s20 = sshll.u32 %s990_s5, 4  ;;  %vm564_vm8 = vcmask 1040384   ;;  %s580_s20 = int_to_ptr.hbm [resolvable:$true] %s579_s20 }
   0xb   :  { %v31_v14 = vld [vmem:[%s986_s1 + $0x48] sm:$0xff]  ;;  %v49_v16 = vld [vmem:[%s987_s2 + $0x38] sm:$0xff]  ;;  %v48_v17 = vld [vmem:[%s987_s2 + $0x30] sm:$0xff] }
   0xc   :  { %85 = vperm.xlu2 %630, %v47_v10   ;;  %v24_v18 = vld [vmem:[%s986_s1 + $0x10] sm:$0xff]  ;;  %v53_v20 = vld [vmem:[%s987_s2 + $0x58] sm:$0xff]  ;;  %v51_v22 = vld [vmem:[%s987_s2 + $0x48] sm:$0xff] }
   0xd   :  { %75 = vperm.xlu1 %629, %v45_v11   ;;  %65 = vperm.xlu0 %628, %v43_v12   ;;  %v32_v19 = vld [vmem:[%s986_s1 + $0x50] sm:$0xff]  ;;  %v25_v23 = vld [vmem:[%s986_s1 + $0x18] sm:$0xff]  ;;  %v350_v25 = vld [vmem:[%s988_s3 + $0x8] sm:$0xff] }
   0xe   :  { %v52_v21 = vld [vmem:[%s987_s2 + $0x50] sm:$0xff]  ;;  %v33_v24 = vld [vmem:[%s986_s1 + $0x58] sm:$0xff]  ;;  %v349_v26 = vld [vmem:[%s988_s3] sm:$0xff] }
   0xf   :  { %v54_v27 = vld [vmem:[%s987_s2 + $0x60] sm:$0xff]  ;;  %v352_v31 = vld [vmem:[%s988_s3 + $0x18] sm:$0xff]  ;;  %v351_v32 = vld [vmem:[%s988_s3 + $0x10] sm:$0xff] }
  0x10   :  { %589 = vmatmul.msk.f32.gmra.mxu0 %vm138_vm0, %v23_v13  ;;  %597 = vmatmul.msk.f32.gmra.mxu2 %vm138_vm0, %v31_v14  ;;  %v26_v28 = vld [vmem:[%s986_s1 + $0x20] sm:$0xff]  ;;  %v27_v33 = vld [vmem:[%s986_s1 + $0x28] sm:$0xff]  ;;  %v356_v35 = vld [vmem:[%s988_s3 + $0x38] sm:$0xff] }
  0x11   :  { %605 = vmatmul.msk.f32.gmra.mxu1 %vm138_vm0, %v23_v13  ;;  %613 = vmatmul.msk.f32.gmra.mxu3 %vm138_vm0, %v31_v14  ;;  %v34_v29 = vld [vmem:[%s986_s1 + $0x60] sm:$0xff]  ;;  %v35_v34 = vld [vmem:[%s986_s1 + $0x68] sm:$0xff]  ;;  %v355_v36 = vld [vmem:[%s988_s3 + $0x30] sm:$0xff] }
  0x12   :  { %v353_v30 = vld [vmem:[%s988_s3 + $0x20] sm:$0xff]  ;;  %v354_v37 = vld [vmem:[%s988_s3 + $0x28] sm:$0xff]  ;;  %v28_v38 = vld [vmem:[%s986_s1 + $0x30] sm:$0xff] }
  0x13   :  { %v36_v39 = vld [vmem:[%s986_s1 + $0x70] sm:$0xff]  ;;  %v358_v41 = vld [vmem:[%s988_s3 + $0x48] sm:$0xff]  ;;  %v357_v42 = vld [vmem:[%s988_s3 + $0x40] sm:$0xff] }
  0x14   :  { %100 = vperm.xlu2 %630, %v50_v15   ;;  %v359_v40 = vld [vmem:[%s988_s3 + $0x50] sm:$0xff]  ;;  %v29_v43 = vld [vmem:[%s986_s1 + $0x38] sm:$0xff]  ;;  %v55_v47 = vld [vmem:[%s987_s2 + $0x68] sm:$0xff] }
  0x15   :  { %95 = vperm.xlu1 %629, %v49_v16   ;;  %90 = vperm.xlu0 %628, %v48_v17   ;;  %v37_v44 = vld [vmem:[%s986_s1 + $0x78] sm:$0xff]  ;;  %v56_v45 = vld [vmem:[%s987_s2 + $0x70] sm:$0xff]  ;;  %v362_v48 = vld [vmem:[%s988_s3 + $0x68] sm:$0xff] }
  0x16   :  { %v360_v46 = vld [vmem:[%s988_s3 + $0x58] sm:$0xff]  ;;  %v361_v50 = vld [vmem:[%s988_s3 + $0x60] sm:$0xff]  ;;  %v363_v52 = vld [vmem:[%s988_s3 + $0x70] sm:$0xff] }
  0x17   :  { %v57_v49 = vld [vmem:[%s987_s2 + $0x78] sm:$0xff] }
  0x18   :  { %590 = vmatmul.msk.f32.gmra.mxu0 %vm138_vm0, %v24_v18  ;;  %598 = vmatmul.msk.f32.gmra.mxu2 %vm138_vm0, %v32_v19  ;;  %v364_v51 = vld [vmem:[%s988_s3 + $0x78] sm:$0xff] }
  0x19   :  { %606 = vmatmul.msk.f32.gmra.mxu1 %vm138_vm0, %v24_v18  ;;  %614 = vmatmul.msk.f32.gmra.mxu3 %vm138_vm0, %v32_v19 }
  0x1c   :  { %115 = vperm.xlu2 %630, %v53_v20  }
  0x1d   :  { %110 = vperm.xlu1 %629, %v52_v21   ;;  %105 = vperm.xlu0 %628, %v51_v22  }
  0x20   :  { %591 = vmatmul.msk.f32.gmra.mxu0 %vm138_vm0, %v25_v23  ;;  %599 = vmatmul.msk.f32.gmra.mxu2 %vm138_vm0, %v33_v24 }
  0x21   :  { %607 = vmatmul.msk.f32.gmra.mxu1 %vm138_vm0, %v25_v23  ;;  %615 = vmatmul.msk.f32.gmra.mxu3 %vm138_vm0, %v33_v24 }
  0x24   :  { %372 = vperm.xlu2 %630, %v350_v25  }
  0x25   :  { %367 = vperm.xlu1 %629, %v349_v26   ;;  %120 = vperm.xlu0 %628, %v54_v27  }
  0x28   :  { %592 = vmatmul.msk.f32.gmra.mxu0 %vm138_vm0, %v26_v28  ;;  %600 = vmatmul.msk.f32.gmra.mxu2 %vm138_vm0, %v34_v29 }
  0x29   :  { %608 = vmatmul.msk.f32.gmra.mxu1 %vm138_vm0, %v26_v28  ;;  %616 = vmatmul.msk.f32.gmra.mxu3 %vm138_vm0, %v34_v29 }
  0x2c   :  { %387 = vperm.xlu2 %630, %v353_v30  }
  0x2d   :  { %382 = vperm.xlu1 %629, %v352_v31   ;;  %377 = vperm.xlu0 %628, %v351_v32  }
  0x30   :  { %593 = vmatmul.msk.f32.gmra.mxu0 %vm138_vm0, %v27_v33  ;;  %601 = vmatmul.msk.f32.gmra.mxu2 %vm138_vm0, %v35_v34 }
  0x31   :  { %609 = vmatmul.msk.f32.gmra.mxu1 %vm138_vm0, %v27_v33  ;;  %617 = vmatmul.msk.f32.gmra.mxu3 %vm138_vm0, %v35_v34 }
  0x34   :  { %402 = vperm.xlu2 %630, %v356_v35  }
  0x35   :  { %397 = vperm.xlu1 %629, %v355_v36   ;;  %392 = vperm.xlu0 %628, %v354_v37  }
  0x38   :  { %594 = vmatmul.msk.f32.gmra.mxu0 %vm138_vm0, %v28_v38  ;;  %602 = vmatmul.msk.f32.gmra.mxu2 %vm138_vm0, %v36_v39 }
  0x39   :  { %610 = vmatmul.msk.f32.gmra.mxu1 %vm138_vm0, %v28_v38  ;;  %618 = vmatmul.msk.f32.gmra.mxu3 %vm138_vm0, %v36_v39 }
  0x3c   :  { %417 = vperm.xlu2 %630, %v359_v40  }
  0x3d   :  { %412 = vperm.xlu1 %629, %v358_v41   ;;  %407 = vperm.xlu0 %628, %v357_v42  }
  0x40   :  { %595 = vmatmul.msk.f32.gmra.mxu0 %vm138_vm0, %v29_v43  ;;  %603 = vmatmul.msk.f32.gmra.mxu2 %vm138_vm0, %v37_v44 }
  0x41   :  { %611 = vmatmul.msk.f32.gmra.mxu1 %vm138_vm0, %v29_v43  ;;  %619 = vmatmul.msk.f32.gmra.mxu3 %vm138_vm0, %v37_v44 }
  0x44   :  { %130 = vperm.xlu2 %630, %v56_v45  }
  0x45   :  { %422 = vperm.xlu1 %629, %v360_v46   ;;  %125 = vperm.xlu0 %628, %v55_v47  }
  0x4c   :  { %432 = vperm.xlu2 %630, %v362_v48  }
  0x4d   :  { %135 = vperm.xlu1 %629, %v57_v49   ;;  %427 = vperm.xlu0 %628, %v361_v50  }
  0x55   :  { %442 = vperm.xlu1 %629, %v364_v51   ;;  %437 = vperm.xlu0 %628, %v363_v52  }
  0x5e   :  { %v81_v53 = vpop.permute.xlu2 %80 }
  0x66   :  { %v885_v56 = vpop.permute.xlu2 %85 }
  0x6e   :  { %v887_v60 = vpop.permute.xlu2 %100 }
  0x76   :  { %v901_v6 = vpop.permute.xlu2 %115 }
  0x77   :  { %v71_v54 = vpop.permute.xlu1 %70  ;;  %v61_v55 = vpop.permute.xlu0 %60 }
  0x7e   :  { %v373_v13 = vpop.permute.xlu2 %372 }
  0x7f   :  { %v76_v57 = vpop.permute.xlu1 %75  ;;  %v66_v58 = vpop.permute.xlu0 %65 }
  0x85   :  { %v204_v59 = vpop.f32.mrf.mxu0 }
  0x86   :  { %v269_v61 = vpop.f32.mrf.mxu1  ;;  %v388_v22 = vpop.permute.xlu2 %387  ;;  %v205_v28 = vadd.f32 %v204_v59, %v61_v55 }
  0x87   :  { %v889_v62 = vpop.permute.xlu1 %95  ;;  %v891_v63 = vpop.permute.xlu0 %90  ;;  %v270_v31 = vadd.f32 %v269_v61, %v61_v55 }
  0x88   :  { %v317_v39 = vmax.f32 %v205_v28, 0.0 }
  0x89   :  { %v318_v42 = vmax.f32 %v270_v31, 0.0 }
  0x8b   :  { %v893_v0 = vpop.f32.mrf.mxu2 }
  0x8c   :  { %v895_v1 = vpop.f32.mrf.mxu3 }
  0x8d   :  { %v207_v2 = vpop.f32.mrf.mxu0 }
  0x8e   :  { %v272_v3 = vpop.f32.mrf.mxu1  ;;  %v208_v29 = vadd.f32 %v207_v2, %v66_v58  ;;  %v923_v36 = vpop.permute.xlu2 %402 }
  0x8f   :  { %v897_v4 = vpop.permute.xlu1 %110  ;;  %v899_v5 = vpop.permute.xlu0 %105  ;;  %v273_v32 = vadd.f32 %v272_v3, %v66_v58 }
  0x90   :  { %v319_v40 = vmax.f32 %v208_v29, 0.0 }
  0x91   :  { %v320_v43 = vmax.f32 %v273_v32, 0.0 }
  0x92   :  { %v447_v55 = vmul.f32 %v373_v13, %v319_v40 }
  0x93   :  { %v903_v7 = vpop.f32.mrf.mxu2  ;;  %v448_v2 = vmul.f32 %v373_v13, %v320_v43 }
  0x94   :  { %v905_v8 = vpop.f32.mrf.mxu3 }
  0x95   :  { %v210_v9 = vpop.f32.mrf.mxu0 }
  0x96   :  { %v275_v10 = vpop.f32.mrf.mxu1  ;;  %v211_v34 = vadd.f32 %v210_v9, %v71_v54 }
  0x97   :  { %v368_v11 = vpop.permute.xlu1 %367  ;;  %v907_v12 = vpop.permute.xlu0 %120  ;;  %v276_v37 = vadd.f32 %v275_v10, %v71_v54 }
  0x98   :  { %v321_v46 = vmax.f32 %v211_v34, 0.0  ;;  %v445_v47 = vmul.f32 %v368_v11, %v317_v39  ;;  %v446_v50 = vmul.f32 %v368_v11, %v318_v42  ;;  %v229_v42 = vadd.f32 %v893_v0, %v887_v60 }
  0x99   :  { %v322_v49 = vmax.f32 %v276_v37, 0.0 }
  0x9b   :  { %v909_v14 = vpop.f32.mrf.mxu2 }
  0x9c   :  { %v911_v15 = vpop.f32.mrf.mxu3  ;;  %v235_v0 = vadd.f32 %v909_v14, %v897_v4 }
  0x9d   :  { %v213_v16 = vpop.f32.mrf.mxu0 }
  0x9e   :  { %v278_v17 = vpop.f32.mrf.mxu1  ;;  %v214_v41 = vadd.f32 %v213_v16, %v76_v57  ;;  %v477_v16 = vadd.f32 %v447_v55, %v445_v47 }
  0x9f   :  { %v383_v18 = vpop.permute.xlu1 %382  ;;  %v378_v19 = vpop.permute.xlu0 %377  ;;  %v279_v44 = vadd.f32 %v278_v17, %v76_v57 }
  0xa0   :  { %v323_v54 = vmax.f32 %v214_v41, 0.0  ;;  %v449_v58 = vmul.f32 %v378_v19, %v321_v46  ;;  %v450_v57 = vmul.f32 %v378_v19, %v322_v49  ;;  %v232_v49 = vadd.f32 %v903_v7, %v899_v5 }
  0xa1   :  { %v324_v3 = vmax.f32 %v279_v44, 0.0 }
  0xa2   :  { %v451_v29 = vmul.f32 %v383_v18, %v323_v54  ;;  %v478_v31 = vadd.f32 %v477_v16, %v449_v58  ;;  %v335_v16 = vmax.f32 %v232_v49, 0.0 }
  0xa3   :  { %v913_v20 = vpop.f32.mrf.mxu2  ;;  %v452_v13 = vmul.f32 %v383_v18, %v324_v3 }
  0xa4   :  { %v915_v21 = vpop.f32.mrf.mxu3  ;;  %v479_v43 = vadd.f32 %v478_v31, %v451_v29  ;;  %v238_v14 = vadd.f32 %v913_v20, %v901_v6 }
  0xa5   :  { %v216_v23 = vpop.f32.mrf.mxu0 }
  0xa6   :  { %v281_v24 = vpop.f32.mrf.mxu1  ;;  %v217_v48 = vadd.f32 %v216_v23, %v81_v53  ;;  %v498_v23 = vadd.f32 %v448_v2, %v446_v50 }
  0xa7   :  { %v917_v25 = vpop.permute.xlu1 %397  ;;  %v393_v26 = vpop.permute.xlu0 %392  ;;  %v282_v51 = vadd.f32 %v281_v24, %v81_v53 }
  0xa8   :  { %v325_v17 = vmax.f32 %v217_v48, 0.0  ;;  %v499_v34 = vadd.f32 %v498_v23, %v450_v57  ;;  %v297_v57 = vadd.f32 %v905_v8, %v899_v5 }
  0xa9   :  { %v326_v24 = vmax.f32 %v282_v51, 0.0 }
  0xaa   :  { %v500_v46 = vadd.f32 %v499_v34, %v452_v13  ;;  %v336_v20 = vmax.f32 %v297_v57, 0.0 }
  0xab   :  { %v919_v27 = vpop.f32.mrf.mxu2  ;;  %v454_v39 = vmul.f32 %v388_v22, %v326_v24 }
  0xac   :  { %v921_v30 = vpop.f32.mrf.mxu3  ;;  %v241_v5 = vadd.f32 %v919_v27, %v907_v12 }
  0xad   :  { %v219_v33 = vpop.f32.mrf.mxu0  ;;  %v501_v58 = vadd.f32 %v500_v46, %v454_v39  ;;  %v306_v29 = vadd.f32 %v921_v30, %v907_v12 }
  0xae   :  { %v284_v35 = vpop.f32.mrf.mxu1  ;;  %v220_v59 = vadd.f32 %v219_v33, %v885_v56  ;;  %v937_v33 = vpop.permute.xlu2 %417  ;;  %v341_v30 = vmax.f32 %v241_v5, 0.0 }
  0xaf   :  { %v925_v38 = vpop.permute.xlu0 %407  ;;  %v927_v45 = vpop.permute.xlu1 %412  ;;  %v285_v9 = vadd.f32 %v284_v35, %v885_v56  ;;  %v453_v56 = vmul.f32 %v388_v22, %v325_v17 }
  0xb0   :  { %v327_v32 = vmax.f32 %v220_v59, 0.0  ;;  %v300_v59 = vadd.f32 %v911_v15, %v897_v4  ;;  %v303_v4 = vadd.f32 %v915_v21, %v901_v6  ;;  %v339_v6 = vmax.f32 %v238_v14, 0.0 }
  0xb1   :  { %v328_v19 = vmax.f32 %v285_v9, 0.0  ;;  %v480_v50 = vadd.f32 %v479_v43, %v453_v56  ;;  %v463_v21 = vmul.f32 %v927_v45, %v335_v16  ;;  %v464_v27 = vmul.f32 %v927_v45, %v336_v20 }
  0xb2   :  { %v455_v44 = vmul.f32 %v393_v26, %v327_v32  ;;  %v338_v24 = vmax.f32 %v300_v59, 0.0  ;;  %v342_v43 = vmax.f32 %v306_v29, 0.0  ;;  %v520_v29 = vstv %s989_s4  ;;  %s666_s4 = smov [#allocation3]  }
  0xb3   :  { %v929_v52 = vpop.f32.mrf.mxu2  ;;  %v456_v47 = vmul.f32 %v393_v26, %v328_v19  ;;  %v333_v26 = vmax.f32 %v229_v42, 0.0  ;;  %v340_v19 = vmax.f32 %v303_v4, 0.0  ;;  %s577_s17 = sshll.u32 %s666_s4, 4  ;;  %s578_s17 = int_to_ptr.vmem [resolvable:$true] %s577_s17 }
  0xb4   :  { %v932_v61 = vpop.f32.mrf.mxu3  ;;  %v481_v7 = vadd.f32 %v480_v50, %v455_v44  ;;  %v466_v12 = vmul.f32 %v937_v33, %v338_v24 }
  0xb5   :  { %v222_v10 = vpop.f32.mrf.mxu0  ;;  %v502_v9 = vadd.f32 %v501_v58, %v456_v47  ;;  %v461_v8 = vmul.f32 %v925_v38, %v333_v26 }
  0xb6   :  { %v223_v11 = vadd.f32 %v222_v10, %v891_v63  ;;  %v287_v53 = vpop.f32.mrf.mxu1 }
  0xb7   :  { %v288_v28 = vadd.f32 %v287_v53, %v891_v63  ;;  %v126_v37 = vpop.permute.xlu0 %125  ;;  %v423_v41 = vpop.permute.xlu1 %422  ;;  %v294_v63 = vadd.f32 %v895_v1, %v887_v60 }
  0xb8   :  { %v329_v35 = vmax.f32 %v223_v11, 0.0  ;;  %v131_v11 = vpop.permute.xlu2 %130  ;;  %v309_v56 = vadd.f32 %v932_v61, %v126_v37  ;;  %v467_v44 = vmul.f32 %v423_v41, %v339_v6 }
  0xb9   :  { %v330_v40 = vmax.f32 %v288_v28, 0.0  ;;  %v334_v3 = vmax.f32 %v294_v63, 0.0  ;;  %v468_v63 = vmul.f32 %v423_v41, %v340_v19 }
  0xba   :  { %v457_v22 = vmul.f32 %v917_v25, %v329_v35  ;;  %v344_v45 = vmax.f32 %v309_v56, 0.0 }
  0xbb   :  { %v246_v48 = vpop.f32.mrf.mxu2  ;;  %v458_v60 = vmul.f32 %v917_v25, %v330_v40  ;;  %v462_v31 = vmul.f32 %v925_v38, %v334_v3 }
  0xbc   :  { %v311_v51 = vpop.f32.mrf.mxu3  ;;  %v482_v17 = vadd.f32 %v481_v7, %v457_v22  ;;  %v247_v47 = vadd.f32 %v246_v48, %v131_v11 }
  0xbd   :  { %v225_v18 = vpop.f32.mrf.mxu0  ;;  %v503_v15 = vadd.f32 %v502_v9, %v458_v60  ;;  %v312_v50 = vadd.f32 %v311_v51, %v131_v11 }
  0xbe   :  { %v226_v55 = vadd.f32 %v225_v18, %v889_v62  ;;  %v290_v54 = vpop.f32.mrf.mxu1 }
  0xbf   :  { %v291_v1 = vadd.f32 %v290_v54, %v889_v62  ;;  %v337_v62 = vmax.f32 %v235_v0, 0.0  ;;  %v428_v23 = vpop.permute.xlu0 %427  ;;  %v136_v13 = vpop.permute.xlu1 %135  ;;  %v346_v7 = vmax.f32 %v312_v50, 0.0  ;;  %v567_v50 = vlaneseq }
  0xc0   :  { %v331_v2 = vmax.f32 %v226_v55, 0.0  ;;  %v469_v22 = vmul.f32 %v428_v23, %v341_v30  ;;  %v433_v54 = vpop.permute.xlu2 %432  ;;  %v470_v0 = vmul.f32 %v428_v23, %v342_v43 }
  0xc1   :  { %v332_v10 = vmax.f32 %v291_v1, 0.0  ;;  %v465_v40 = vmul.f32 %v937_v33, %v337_v62  ;;  %v345_v1 = vmax.f32 %v247_v47, 0.0  ;;  %v472_v41 = vmul.f32 %v433_v54, %v344_v45 }
  0xc2   :  { %v459_v25 = vmul.f32 %v923_v36, %v331_v2  ;;  %vm569_vm10 = vcmp.lt.s32.totalorder %v567_v50, 256 }
  0xc3   :  { %v460_v53 = vmul.f32 %v923_v36, %v332_v10  ;;  %v244_v36 = vadd.f32 %v929_v52, %v126_v37  ;;  %v249_v39 = vpop.f32.mrf.mxu2 }
  0xc4   :  { %v483_v28 = vadd.f32 %v482_v17, %v459_v25  ;;  %v314_v42 = vpop.f32.mrf.mxu3  ;;  %v250_v49 = vadd.f32 %v249_v39, %v136_v13 }
  0xc5   :  { %v504_v32 = vadd.f32 %v503_v15, %v460_v53  ;;  %v343_v52 = vmax.f32 %v244_v36, 0.0  ;;  %v315_v37 = vadd.f32 %v314_v42, %v136_v13 }
  0xc6   :  { %v484_v34 = vadd.f32 %v483_v28, %v461_v8  ;;  %v347_v59 = vmax.f32 %v250_v49, 0.0 }
  0xc7   :  { %v505_v35 = vadd.f32 %v504_v32, %v462_v31  ;;  %v438_v58 = vpop.permute.xlu0 %437  ;;  %v471_v60 = vmul.f32 %v433_v54, %v343_v52  ;;  %v348_v48 = vmax.f32 %v315_v37, 0.0  ;;  %v443_v3 = vpop.permute.xlu1 %442 }
  0xc8   :  { %v485_v38 = vadd.f32 %v484_v34, %v463_v21  ;;  %v473_v57 = vmul.f32 %v438_v58, %v345_v1  ;;  %v474_v51 = vmul.f32 %v438_v58, %v346_v7  ;;  %v475_v16 = vmul.f32 %v443_v3, %v347_v59 }
  0xc9   :  { %v506_v46 = vadd.f32 %v505_v35, %v464_v27  ;;  %v476_v17 = vmul.f32 %v443_v3, %v348_v48 }
  0xca   :  { %v486_v18 = vadd.f32 %v485_v38, %v465_v40 }
  0xcb   :  { %v507_v61 = vadd.f32 %v506_v46, %v466_v12 }
  0xcc   :  { %v487_v55 = vadd.f32 %v486_v18, %v467_v44 }
  0xcd   :  { %v508_v33 = vadd.f32 %v507_v61, %v468_v63 }
  0xce   :  { %v488_v26 = vadd.f32 %v487_v55, %v469_v22 }
  0xcf   :  { %v509_v2 = vadd.f32 %v508_v33, %v470_v0 }
  0xd0   :  { %v489_v9 = vadd.f32 %v488_v26, %v471_v60 }
  0xd1   :  { %v510_v10 = vadd.f32 %v509_v2, %v472_v41 }
  0xd2   :  { %v490_v14 = vadd.f32 %v489_v9, %v473_v57 }
  0xd3   :  { %v511_v25 = vadd.f32 %v510_v10, %v474_v51 }
  0xd4   :  { %v491_v62 = vadd.f32 %v490_v14, %v475_v16 }
  0xd5   :  { %v512_v11 = vadd.f32 %v511_v25, %v476_v17 }
  0xd6   :  { %v492_v4 = vrot.slane %v491_v62, 4 }
  0xd7   :  { %v513_v15 = vrot.slane %v512_v11, 4 }
  0xd8   :  { %v493_v53 = vadd.f32 %v492_v4, %v491_v62 }
  0xd9   :  { %v514_v23 = vadd.f32 %v513_v15, %v512_v11 }
  0xda   :  { %v494_v24 = vrot.slane %v493_v53, 2 }
  0xdb   :  { %v515_v5 = vrot.slane %v514_v23, 2 }
  0xdc   :  { %v495_v8 = vadd.f32 %v494_v24, %v493_v53 }
  0xdd   :  { %v516_v28 = vadd.f32 %v515_v5, %v514_v23 }
  0xde   :  { %v496_v20 = vrot.slane %v495_v8, 1 }
  0xdf   :  { %v517_v31 = vrot.slane %v516_v28, 1 }
  0xe0   :  { %v497_v32 = vadd.f32 %v496_v20, %v495_v8 }
  0xe1   :  { %v518_v13 = vadd.f32 %v517_v31, %v516_v28 }
  0xe2   :  { %v521_v6 = vadd.f32 %v520_v29, %v497_v32 }
  0xe3   :  { %v522_v21 = vadd.f32 %v520_v29, %v518_v13 }
  0xe4   :  { %v620_v36 = vmul.f32 -1.442695, %v521_v6 }
  0xe5   :  { %v621_v34 = vmul.f32 -1.442695, %v522_v21 }
  0xe6   :  { %631 = vpow2.f32 %v620_v36 }
  0xe7   :  { %633 = vpow2.f32 %v621_v34 }
  0xec   :  { %v632_v19 = vpop.eup %631 }
  0xed   :  { %v634_v27 = vpop.eup %633  ;;  %v529_v56 = vadd.f32 1.0, %v632_v19 }
  0xee   :  { %v530_v35 = vadd.f32 1.0, %v634_v27 }
  0xef   :  { %635 = vrcp.f32 %v529_v56  ;;  %vm536_vm3 = vweird.f32 %v529_v56  ;;  %v542_v47 = vand.u32 2147483648, %v529_v56  ;;  %v540_v49 = vand.u32 2147483647, %v529_v56 }
  0xf0   :  { %637 = vrcp.f32 %v530_v35  ;;  %v557_v44 = vand.u32 2147483648, %v530_v35  ;;  %v555_v46 = vand.u32 2147483647, %v530_v35  ;;  %vm551_vm5 = vweird.f32 %v530_v35 }
  0xf1   :  { %v543_v55 = vor.u32 1.1754944e-38, %v542_v47  ;;  %vm541_vm9 = vcmp.eq.f32.partialorder %v540_v49, 8.507059e+37 }
  0xf2   :  { %v558_v61 = vor.u32 1.1754944e-38, %v557_v44  ;;  %vm556_vm7 = vcmp.eq.f32.partialorder %v555_v46, 8.507059e+37 }
  0xf5   :  { %v636_v39 = vpop.eup %635 }
  0xf6   :  { %v638_v40 = vpop.eup %637  ;;  %v532_v12 = vmul.f32 %v636_v39, %v529_v56  ;;  %vm537_vm1 = vweird.f32 %v636_v39 }
  0xf7   :  { %v547_v30 = vmul.f32 %v638_v40, %v530_v35  ;;  %vm552_vm2 = vweird.f32 %v638_v40  ;;  %vm976_vm4 = vmor %vm536_vm3, %vm537_vm1 }
  0xf8   :  { %v533_v38 = vsub.f32 1.0, %v532_v12  ;;  %vm553_vm6 = vmor %vm551_vm5, %vm552_vm2 }
  0xf9   :  { %v548_v42 = vsub.f32 1.0, %v547_v30 }
  0xfa   :  { %v534_v43 = vmul.f32 %v636_v39, %v533_v38 }
  0xfb   :  { %v549_v63 = vmul.f32 %v638_v40, %v548_v42 }
  0xfc   :  { %v535_v52 = vadd.f32 %v636_v39, %v534_v43 }
  0xfd   :  { %v550_v45 = vadd.f32 %v638_v40, %v549_v63 }
  0xfe   :  { %v539_v37 = vsel %vm976_vm4, %v636_v39, %v535_v52 }
  0xff   :  { %v554_v22 = vsel %vm553_vm6, %v638_v40, %v550_v45  ;;  %v544_v33 = vsel %vm541_vm9, %v543_v55, %v539_v37 }
 0x100   :  { %v559_v54 = vsel %vm556_vm7, %v558_v61, %v554_v22 }
 0x101   :  { %v563_v0 = vrot.slane %v559_v54, 7 }
 0x103   :  { %v565_v58 = vsel %vm564_vm8, %v544_v33, %v563_v0 }
 0x104   :  { %571 = vst.msk [vmem:[#allocation3] sm:$0x3] %vm569_vm10, %v565_v58 }
 0x105   :  { %582 = dma.vmem_to_hbm [thread:$0]  %s578_s17, 32, %s580_s20, [#allocation4]  }
 0x106   :  { %663 = dma.done.wait [#allocation4], 32  }
 0x107   :  { %664 = vsyncadd [#allocation4], 4294967264 }
 0x108   :  { %587 = vsyncpa [#allocation4], 1 }

</bundles_post_ra>
